<compile_context>
chip_gen: v6e
topology: v6e:2x2x1
jax: 0.10.0
libtpu: 0.0.40
codegen_flags: <defaults>
</compile_context>

<pallas_src>
import functools
import math

import jax
import jax.numpy as jnp
import numpy as np
from jax.experimental import pallas as pl
from jax.experimental.pallas import tpu as pltpu

_LANE = 128
_VMEM_LIMIT_BYTES = 48 * 1024 * 1024  # below v7x's 64 MiB physical VMEM


def _ffn_kernel(x_ref, m_ref, w1_ref, b1_ref, w2_ref, b2_ref, o_ref,
                *, K, pad_l, activation, compute_dtype):
    """Fused FFN forward for one batch element.

    x_ref : (1, C_in, T_pad)     m_ref : (1, 1, T_pad)
    w1_ref: (F, K*C_in)  bf16    b1_ref: (F, 1)     f32
    w2_ref: (C_out, K*F) bf16    b2_ref: (C_out, 1) f32
    o_ref : (1, C_out, T_pad)
    """
    m = m_ref[0].astype(jnp.float32)                      # (1, T_pad)
    x = x_ref[0].astype(jnp.float32)                      # (C_in, T_pad)
    t_pad = x.shape[-1]

    def im2col(v):
        # v: (C, T_pad) f32, zero in columns [T, T_pad).
        # Returns (K*C, T_pad) in compute_dtype where rows k*C:(k+1)*C hold
        # v shifted by (k - pad_l); lane rotation wrap-around falls into the
        # zero tail (or into masked output columns), which emulates the
        # zero-padding of the reference conv.
        taps = []
        for k in range(K):
            shift = (pad_l - k) % t_pad
            taps.append(v if shift == 0 else pltpu.roll(v, shift=shift, axis=1))
        stacked = taps[0] if K == 1 else jnp.concatenate(taps, axis=0)
        return stacked.astype(compute_dtype)

    # ---- conv_1: single im2col matmul on the MXU -----------------------
    h = jnp.dot(w1_ref[...], im2col(x * m),
                preferred_element_type=jnp.float32)        # (F, T_pad)
    h = h + b1_ref[...]

    # ---- activation (f32 on VPU/EUP) ------------------------------------
    if activation == "gelu":
        h = h * jax.nn.sigmoid(1.702 * h)
    else:
        h = jnp.maximum(h, 0.0)
    # TODO(synk): dropout with p_dropout > 0 (training mode) not implemented.

    # ---- conv_2 on masked hidden ----------------------------------------
    y = jnp.dot(w2_ref[...], im2col(h * m),
                preferred_element_type=jnp.float32)        # (C_out, T_pad)
    y = y + b2_ref[...]

    o_ref[0] = (y * m).astype(o_ref.dtype)


def ffn_pallas(x, x_mask, w1, b1, w2, b2, *, kernel_size, activation=None,
               causal=False, compute_dtype=jnp.bfloat16):
    """x: (B, C_in, T), x_mask: (B, 1, T), w1: (F, C_in, K), w2: (C_out, F, K)."""
    B, C_in, T = x.shape
    F_ch = w1.shape[0]
    C_out = w2.shape[0]
    K = kernel_size

    if K == 1:
        pad_l = 0
    elif causal:
        pad_l = K - 1
    else:
        pad_l = (K - 1) // 2

    # Lane-dense time: multiple of 128 and >= T + K - 1 so the zero tail can
    # serve both as the conv padding and as the roll wrap-around target.
    T_pad = max(pl.cdiv(T + K - 1, _LANE) * _LANE, _LANE)
    if T_pad != T:
        tail = T_pad - T
        x = jnp.pad(x, ((0, 0), (0, 0), (0, tail)))
        x_mask = jnp.pad(x_mask, ((0, 0), (0, 0), (0, tail)))

    # Flatten conv weights for im2col:  (out, in, K) -> (out, K*in), bf16.
    w1f = jnp.transpose(w1, (0, 2, 1)).reshape(F_ch, K * C_in).astype(compute_dtype)
    w2f = jnp.transpose(w2, (0, 2, 1)).reshape(C_out, K * F_ch).astype(compute_dtype)
    b1c = b1.reshape(F_ch, 1).astype(jnp.float32)
    b2c = b2.reshape(C_out, 1).astype(jnp.float32)

    kernel = functools.partial(_ffn_kernel, K=K, pad_l=pad_l,
                               activation=activation, compute_dtype=compute_dtype)

    flops = 2 * B * T_pad * K * (F_ch * C_in + C_out * F_ch)
    transcendentals = B * F_ch * T_pad if activation == "gelu" else 0
    bytes_accessed = (x.size * x.dtype.itemsize
                      + x_mask.size * x_mask.dtype.itemsize
                      + w1f.size * w1f.dtype.itemsize
                      + w2f.size * w2f.dtype.itemsize
                      + b1c.size * 4 + b2c.size * 4
                      + B * C_out * T_pad * x.dtype.itemsize)

    out = pl.pallas_call(
        kernel,
        out_shape=jax.ShapeDtypeStruct((B, C_out, T_pad), x.dtype),
        grid_spec=pltpu.PrefetchScalarGridSpec(
            num_scalar_prefetch=0,
            grid=(B,),
            in_specs=[
                pl.BlockSpec((1, C_in, T_pad), lambda b: (b, 0, 0)),
                pl.BlockSpec((1, 1, T_pad), lambda b: (b, 0, 0)),
                pl.BlockSpec((F_ch, K * C_in), lambda b: (0, 0)),
                pl.BlockSpec((F_ch, 1), lambda b: (0, 0)),
                pl.BlockSpec((C_out, K * F_ch), lambda b: (0, 0)),
                pl.BlockSpec((C_out, 1), lambda b: (0, 0)),
            ],
            out_specs=pl.BlockSpec((1, C_out, T_pad), lambda b: (b, 0, 0)),
        ),
        compiler_params=pltpu.CompilerParams(
            dimension_semantics=("parallel",),
            vmem_limit_bytes=_VMEM_LIMIT_BYTES,
        ),
        cost_estimate=pl.CostEstimate(flops=flops,
                                      transcendentals=transcendentals,
                                      bytes_accessed=bytes_accessed),
    )(x, x_mask, w1f, b1c, w2f, b2c)

    return out[:, :, :T]


def ffn_reference(x, x_mask, w1, b1, w2, b2, *, kernel_size,
                  activation=None, causal=False):
    """Pure-JAX f32 reference mirroring the PyTorch FFN.forward."""
    K = kernel_size
    if K == 1:
        pad_l, pad_r = 0, 0
    elif causal:
        pad_l, pad_r = K - 1, 0
    else:
        pad_l, pad_r = (K - 1) // 2, K // 2

    def conv(v, w, b):
        vp = jnp.pad(v, ((0, 0), (0, 0), (pad_l, pad_r)))
        y = jax.lax.conv_general_dilated(
            vp, w, window_strides=(1,), padding="VALID",
            dimension_numbers=("NCH", "OIH", "NCH"))
        return y + b[None, :, None]

    h = conv(x * x_mask, w1, b1)
    if activation == "gelu":
        h = h * jax.nn.sigmoid(1.702 * h)
    else:
        h = jnp.maximum(h, 0.0)
    y = conv(h * x_mask, w2, b2)
    return y * x_mask


if __name__ == "__main__":
    # Small, deterministic setup consistent with FFN(in, out, filter, kernel_size)
    B, C_in, C_out, F_ch, K, T = 2, 8, 8, 16, 3, 32
    activation = "gelu"
    causal = False

    key = jax.random.PRNGKey(0)
    k_x, k_w1, k_b1, k_w2, k_b2 = jax.random.split(key, 5)

    x = jax.random.normal(k_x, (B, C_in, T), jnp.float32)
    # Simple length mask: first sequence full, second half-masked.
    lengths = jnp.array([T, T // 2])
    x_mask = (jnp.arange(T)[None, None, :] < lengths[:, None, None]).astype(jnp.float32)

    # PyTorch Conv1d-style uniform init: U(-1/sqrt(fan_in), 1/sqrt(fan_in))
    bound1 = 1.0 / math.sqrt(C_in * K)
    bound2 = 1.0 / math.sqrt(F_ch * K)
    w1 = jax.random.uniform(k_w1, (F_ch, C_in, K), jnp.float32, -bound1, bound1)
    b1 = jax.random.uniform(k_b1, (F_ch,), jnp.float32, -bound1, bound1)
    w2 = jax.random.uniform(k_w2, (C_out, F_ch, K), jnp.float32, -bound2, bound2)
    b2 = jax.random.uniform(k_b2, (C_out,), jnp.float32, -bound2, bound2)

    out = ffn_pallas(x, x_mask, w1, b1, w2, b2,
                     kernel_size=K, activation=activation, causal=causal)
    out = jax.block_until_ready(out)

    ref = ffn_reference(x, x_mask, w1, b1, w2, b2,
                        kernel_size=K, activation=activation, causal=causal)
    # bf16 MXU operands (f32 accumulation) -> compare with bf16-level tolerance.
    np.testing.assert_allclose(np.asarray(out), np.asarray(ref),
                               rtol=2e-2, atol=1e-2)

    print("KERNEL_OK")
</pallas_src>

<mosaic_0001>
module attributes {stable_mosaic.version = 11 : i64} {
  func.func @_ffn_kernel(%arg0: i32, %arg1: memref<1x8x128xf32, #tpu.memory_space<vmem>>, %arg2: memref<1x1x128xf32, #tpu.memory_space<vmem>>, %arg3: memref<16x24xbf16, #tpu.memory_space<vmem>>, %arg4: memref<16x1xf32, #tpu.memory_space<vmem>>, %arg5: memref<8x48xbf16, #tpu.memory_space<vmem>>, %arg6: memref<8x1xf32, #tpu.memory_space<vmem>>, %arg7: memref<1x8x128xf32, #tpu.memory_space<vmem>>) attributes {dimension_semantics = [#tpu.dimension_semantics<parallel>], iteration_bounds = array<i64: 2>, scalar_prefetch = 0 : i64, scratch_operands = 0 : i64, tpu.core_type = #tpu.core_type<tc>, window_params = [{transform_indices = @transform_0, window_bounds = array<i64: 1, 8, 128>}, {transform_indices = @transform_1, window_bounds = array<i64: 1, 1, 128>}, {pipeline_mode = #tpu.pipeline_mode<synchronous>, transform_indices = @transform_2, window_bounds = array<i64: 16, 24>}, {pipeline_mode = #tpu.pipeline_mode<synchronous>, transform_indices = @transform_3, window_bounds = array<i64: 16, 1>}, {pipeline_mode = #tpu.pipeline_mode<synchronous>, transform_indices = @transform_4, window_bounds = array<i64: 8, 48>}, {pipeline_mode = #tpu.pipeline_mode<synchronous>, transform_indices = @transform_5, window_bounds = array<i64: 8, 1>}, {transform_indices = @transform_6, window_bounds = array<i64: 1, 8, 128>}]} {
    %c0 = arith.constant 0 : index
    %c0_0 = arith.constant 0 : index
    %c0_1 = arith.constant 0 : index
    %0 = vector.load %arg2[%c0, %c0_0, %c0_1] : memref<1x1x128xf32, #tpu.memory_space<vmem>>, vector<1x1x128xf32>
    %1 = vector.shape_cast %0 : vector<1x1x128xf32> to vector<1x128xf32>
    %c0_2 = arith.constant 0 : index
    %c0_3 = arith.constant 0 : index
    %c0_4 = arith.constant 0 : index
    %2 = vector.load %arg1[%c0_2, %c0_3, %c0_4] : memref<1x8x128xf32, #tpu.memory_space<vmem>>, vector<1x8x128xf32>
    %3 = vector.shape_cast %2 : vector<1x8x128xf32> to vector<8x128xf32>
    %c0_5 = arith.constant 0 : index
    %c0_6 = arith.constant 0 : index
    %4 = vector.load %arg3[%c0_5, %c0_6] : memref<16x24xbf16, #tpu.memory_space<vmem>>, vector<16x24xbf16>
    %5 = vector.broadcast %1 : vector<1x128xf32> to vector<8x128xf32>
    %6 = arith.mulf %3, %5 : vector<8x128xf32>
    %c1_i32 = arith.constant 1 : i32
    %7 = tpu.dynamic_rotate %6 by %c1_i32 dim 1 : vector<8x128xf32>, i32 -> vector<8x128xf32>
    %c127_i32 = arith.constant 127 : i32
    %8 = tpu.dynamic_rotate %6 by %c127_i32 dim 1 : vector<8x128xf32>, i32 -> vector<8x128xf32>
    %9 = tpu.concatenate %7, %6, %8 in 0 : vector<8x128xf32>, vector<8x128xf32>, vector<8x128xf32> -> vector<24x128xf32>
    %10 = arith.truncf %9 : vector<24x128xf32> to vector<24x128xbf16>
    %cst = arith.constant dense<0.000000e+00> : vector<16x128xf32>
    %11 = tpu.matmul %4, %10, %cst {dimension_numbers = #tpu.dot_dimension_numbers<[1], [0], [0], [1], [0, 0, 1, 1], [], []>} : vector<16x24xbf16>, vector<24x128xbf16>, vector<16x128xf32> -> vector<16x128xf32>
    %c0_7 = arith.constant 0 : index
    %c0_8 = arith.constant 0 : index
    %12 = vector.load %arg4[%c0_7, %c0_8] : memref<16x1xf32, #tpu.memory_space<vmem>>, vector<16x1xf32>
    %13 = vector.broadcast %12 : vector<16x1xf32> to vector<16x128xf32>
    %14 = arith.addf %11, %13 : vector<16x128xf32>
    %cst_9 = arith.constant 1.702000e+00 : f32
    %15 = vector.broadcast %cst_9 : f32 to vector<16x128xf32>
    %16 = arith.mulf %15, %14 : vector<16x128xf32>
    %17 = arith.negf %16 : vector<16x128xf32>
    %18 = math.exp %17 : vector<16x128xf32>
    %cst_10 = arith.constant 1.000000e+00 : f32
    %19 = vector.broadcast %cst_10 : f32 to vector<16x128xf32>
    %20 = arith.addf %19, %18 : vector<16x128xf32>
    %21 = arith.divf %19, %20 : vector<16x128xf32>
    %22 = arith.mulf %14, %21 : vector<16x128xf32>
    %c0_11 = arith.constant 0 : index
    %c0_12 = arith.constant 0 : index
    %23 = vector.load %arg5[%c0_11, %c0_12] : memref<8x48xbf16, #tpu.memory_space<vmem>>, vector<8x48xbf16>
    %24 = vector.broadcast %1 : vector<1x128xf32> to vector<16x128xf32>
    %25 = arith.mulf %22, %24 : vector<16x128xf32>
    %c1_i32_13 = arith.constant 1 : i32
    %26 = tpu.dynamic_rotate %25 by %c1_i32_13 dim 1 : vector<16x128xf32>, i32 -> vector<16x128xf32>
    %c127_i32_14 = arith.constant 127 : i32
    %27 = tpu.dynamic_rotate %25 by %c127_i32_14 dim 1 : vector<16x128xf32>, i32 -> vector<16x128xf32>
    %28 = tpu.concatenate %26, %25, %27 in 0 : vector<16x128xf32>, vector<16x128xf32>, vector<16x128xf32> -> vector<48x128xf32>
    %29 = arith.truncf %28 : vector<48x128xf32> to vector<48x128xbf16>
    %cst_15 = arith.constant dense<0.000000e+00> : vector<8x128xf32>
    %30 = tpu.matmul %23, %29, %cst_15 {dimension_numbers = #tpu.dot_dimension_numbers<[1], [0], [0], [1], [0, 0, 1, 1], [], []>} : vector<8x48xbf16>, vector<48x128xbf16>, vector<8x128xf32> -> vector<8x128xf32>
    %c0_16 = arith.constant 0 : index
    %c0_17 = arith.constant 0 : index
    %31 = vector.load %arg6[%c0_16, %c0_17] : memref<8x1xf32, #tpu.memory_space<vmem>>, vector<8x1xf32>
    %32 = vector.broadcast %31 : vector<8x1xf32> to vector<8x128xf32>
    %33 = arith.addf %30, %32 : vector<8x128xf32>
    %34 = vector.broadcast %1 : vector<1x128xf32> to vector<8x128xf32>
    %35 = arith.mulf %33, %34 : vector<8x128xf32>
    %c0_18 = arith.constant 0 : index
    %c0_19 = arith.constant 0 : index
    %c0_20 = arith.constant 0 : index
    %36 = vector.load %arg7[%c0_18, %c0_19, %c0_20] : memref<1x8x128xf32, #tpu.memory_space<vmem>>, vector<1x8x128xf32>
    %37 = vector.shape_cast %36 : vector<1x8x128xf32> to vector<8x128xf32>
    %38 = vector.shape_cast %35 : vector<8x128xf32> to vector<1x8x128xf32>
    tpu.vector_store %arg7[%c0_18, %c0_19, %c0_20], %38 {strides = array<i32>} : memref<1x8x128xf32, #tpu.memory_space<vmem>>, vector<1x8x128xf32>,
    return
  }
  func.func @transform_0(%arg0: i32) -> (i32, i32, i32) {
    %c0_i32 = arith.constant 0 : i32
    %c0_i32_0 = arith.constant 0 : i32
    %c0_i32_1 = arith.constant 0 : i32
    return %arg0, %c0_i32, %c0_i32_0 : i32, i32, i32
  }
  func.func @transform_1(%arg0: i32) -> (i32, i32, i32) {
    %c0_i32 = arith.constant 0 : i32
    %c0_i32_0 = arith.constant 0 : i32
    %c0_i32_1 = arith.constant 0 : i32
    return %arg0, %c0_i32, %c0_i32_0 : i32, i32, i32
  }
  func.func @transform_2(%arg0: i32) -> (i32, i32) {
    %c0_i32 = arith.constant 0 : i32
    %c0_i32_0 = arith.constant 0 : i32
    %c0_i32_1 = arith.constant 0 : i32
    return %c0_i32, %c0_i32_0 : i32, i32
  }
  func.func @transform_3(%arg0: i32) -> (i32, i32) {
    %c0_i32 = arith.constant 0 : i32
    %c0_i32_0 = arith.constant 0 : i32
    %c0_i32_1 = arith.constant 0 : i32
    return %c0_i32, %c0_i32_0 : i32, i32
  }
  func.func @transform_4(%arg0: i32) -> (i32, i32) {
    %c0_i32 = arith.constant 0 : i32
    %c0_i32_0 = arith.constant 0 : i32
    %c0_i32_1 = arith.constant 0 : i32
    return %c0_i32, %c0_i32_0 : i32, i32
  }
  func.func @transform_5(%arg0: i32) -> (i32, i32) {
    %c0_i32 = arith.constant 0 : i32
    %c0_i32_0 = arith.constant 0 : i32
    %c0_i32_1 = arith.constant 0 : i32
    return %c0_i32, %c0_i32_0 : i32, i32
  }
  func.func @transform_6(%arg0: i32) -> (i32, i32, i32) {
    %c0_i32 = arith.constant 0 : i32
    %c0_i32_0 = arith.constant 0 : i32
    %c0_i32_1 = arith.constant 0 : i32
    return %arg0, %c0_i32, %c0_i32_0 : i32, i32, i32
  }
}

</mosaic_0001>

<bundles_post_ra>
// kernel: tpu_custom_call.1
= control target key start
LH: loop header
LB: loop body
LE: loop exit
PB: predicated region body
PF: predicated region fallthrough
CT: control target
= control target key end

     0   :  { %11 = vsyncpa [#allocation3], 0  ;;  %s981_s0 = inlined_call_operand.vmem [shape: f32[2,8,128], index: 0, kind: input, shape index: {}]   ;;  %s982_s1 = inlined_call_operand.hbm [shape: f32[2,1,128], index: 1, kind: input, shape index: {}]   ;;  %s983_s2 = inlined_call_operand.vmem [shape: bf16[16,24], index: 2, kind: input, shape index: {}]   ;;  %s984_s3 = inlined_call_operand.vmem [shape: f32[16,1], index: 3, kind: input, shape index: {}]   ;;  %s985_s4 = inlined_call_operand.vmem [shape: bf16[8,48], index: 4, kind: input, shape index: {}]   ;;  %s986_s5 = inlined_call_operand.vmem [shape: f32[8,1], index: 5, kind: input, shape index: {}]   ;;  %s987_s6 = inlined_call_operand.hbm [shape: f32[2,8,128], index: 6, kind: output, shape index: {}]  }
   0x1   :  { %13 = vsyncpa [#allocation3 + $0x1], 0 }
   0x2   :  { %14 = vsyncpa [#allocation4], 0 }
   0x3   :  { %16 = vsyncpa [#allocation4 + $0x1], 0  ;;  %s790_s21 = smov 0   ;;  %s792_s22 = smov 0  }
   0x4   :  { %s794_s23 = smov 0   ;;  %s796_s24 = smov 0  }
   0x5 LB: > { %s811_s25 = sadd.s32 4294967295, %s746_s24   ;;  %s540_s26 = sadd.s32 4294967294, %s746_s24   ;;  %s746_s24 = sphi %s796_s24, %s1004_s24   ;;  %s742_s23 = sphi %s794_s23, %s1003_s23   ;;  %s738_s22 = sphi %s792_s22, %s1002_s22   ;;  %s734_s21 = sphi %s790_s21, %s1001_s21  }
   0x6   : > { %s815_s27 = sadd.s32 1, %s746_s24   ;;  %s55_s28 = sadd.s32 1, %s742_s23 }
   0x7   : > { %s52_s29 = ssub.s32 %s746_s24, %s815_s27  ;;  %p62_p0 = scmp.ne.s32.totalorder %s742_s23, %s738_s22 }
   0x8   : > { %p53_p1 = scmp.eq.s32.totalorder %s52_s29, 0  ;;  %p63_p2 = scmp.eq.s32.totalorder %s746_s24, 0 }
   0x9   : > { %p68_p3 = scmp.ne.s32.totalorder %s738_s22, %s734_s21  ;;  %p69_p4 = scmp.eq.s32.totalorder %s811_s25, 0 }
   0xa   : > { %s827_s30 = scalar_select %p53_p1, %s742_s23, %s55_s28  }
   0xb   : > { %p829_p5 = por %p63_p2, %p62_p0  ;;  %p833_p6 = por %p69_p4, %p68_p3 }
   0xc   : > { %p176_p7 = scmp.eq.s32.totalorder %s811_s25, 1  ;;  %p182_p8 = scmp.eq.s32.totalorder %s540_s26, 1 }
   0xd   : > { %s991_s8 = scalar_select %p833_p6, 1, 0 }
   0xe   : > { %p594_p10 = scmp.lt.s32.totalorder %s746_s24, 2  ;;  %p840_p11 = por %p176_p7, %p62_p0 }
   0xf   : > { %p844_p12 = por %p182_p8, %p68_p3  ;;  %s221_s11 = sand.u32 1, %s742_s23  }
  0x10   : > { %s992_s9 = scalar_select %p840_p11, 1, 0 }
  0x11   : > { %s993_s10 = scalar_select %p844_p12, 1, 0 }
  0x12   : > { %s543_s12 = sshll.u32 %s746_s24, 4  ;;  %s224_s16 = scalar_lea.vmem [#allocation2], %s221_s11 }
  0x13   : > { %s853_s15 = scalar_lea.hbm %s982_s1, %s543_s12  ;;  %s231_s17 = sshll.u32 %s224_s16, 4  ;;  %s855_s17 = int_to_ptr.vmem [resolvable:$true] %s231_s17 }
  0x14   : > { %p859_p13 = pnand %p594_p10, %p829_p5  ;;  %s222_s19 = scalar_lea.sflag [#allocation3], %s221_s11 }
  0x15   : > { %s654_s20 = scalar_lea.hbm %s853_s15, 16  ;;  %s659_s29 = scalar_lea.hbm %s982_s1, 32 }
  0x16   : > { %p655_p2 = scmp.ne.s32.totalorder %s853_s15, %s654_s20  ;;  %p656_p3 = pneg %p859_p13 }
  0x17   : > { %p660_p5 = scmp.lt.s32.totalorder %s853_s15, %s982_s1  ;;  %p661_p8 = scmp.lt.s32.totalorder %s659_s29, %s654_s20 }
  0x18   : > { %p657_p4 = pnand %p656_p3, %p655_p2 }
  0x19   : > { %p662_p10 = por %p661_p8, %p660_p5 }
  0x1a   : > { %p658_p7 = pneg %p657_p4 }
  0x1c   : > { %p663_p9 = pnand %p662_p10, %p658_p7 }
  0x1e   : > { %666 = shalt.err (!%p663_p9)
}
  0x1f   : > { %s667_s11 = scalar_lea.vmem %s855_s17, 16  ;;  %s748_s13 = smov [#allocation2]  }
  0x20   : > { %p668_p0 = scmp.ne.s32.totalorder %s855_s17, %s667_s11  ;;  %s672_s14 = sshll.u32 %s748_s13, 4  ;;  %s673_s14 = int_to_ptr.vmem [resolvable:$false] %s672_s14 }
  0x21   : > { %s674_s16 = scalar_lea.vmem %s673_s14, 32  ;;  %p675_p4 = scmp.lt.s32.totalorder %s855_s17, %s673_s14 }
  0x22   : > { %p670_p1 = pnand %p668_p0, %p656_p3  ;;  %p676_p12 = scmp.lt.s32.totalorder %s674_s16, %s667_s11 }
  0x24   : > { %p671_p2 = pneg %p670_p1  ;;  %p677_p11 = por %p676_p12, %p675_p4 }
  0x26   : > { %p678_p6 = pnand %p677_p11, %p671_p2 }
  0x28   : > { %681 = shalt.err (!%p678_p6)
}
  0x29   : > { %589 = dma.hbm_to_vmem [thread:$0]  (!%p859_p13), %s853_s15, 16, %s855_s17, %s222_s19  }
  0x2a   : > { %p995_p9 = scmp.lt.s32.totalorder %s746_s24, 3  ;;  %p996_p7 = scmp.ge.s32.totalorder %s746_s24, 1 }
  0x2c   : > { %p237_p0 = pnand %p996_p7, %p995_p9 }
  0x2d   : > { %s888_s20 = sand.u32 (!%p237_p0), 1, %s738_s22   ;;  %p997_p6 = scmp.ne.s32.totalorder (!%p237_p0), %s991_s8, 0 }
  0x2e   : > { %240 = sbr.rel (%p237_p0) target bundleno = 766 (0x2fe), region = 44  ;;  %s243_s26 = scalar_lea.sflag (!%p237_p0), [#allocation3], %s888_s20 }
  0x2f   : > { %s245_s28 = scalar_lea.vmem (!%p237_p0), [#allocation2], %s888_s20 }
  0x33   : > { %725 = dma.done.wait (%p997_p6), %s243_s26, 16  }
  0x34   : > { %727 = vsyncadd (%p997_p6), %s243_s26, 4294967280  ;;  %p277_p11 = scmp.lt.s32.totalorder %s811_s25, 1  ;;  %v749_v0 = vmov 0.0   ;;  %vm750_vm0 = vmmov 0   ;;  %v905_v1 = vld [vmem:[%s245_s28] ss:$0 sm:$0xff] }
  0x35   : > { %564 = vmatprep.subr.bf16.mxu0 %v749_v0  ;;  %572 = vmatprep.subr.bf16.mxu1 %v749_v0  ;;  %v751_v4 = vmov 0   ;;  %v299_v5 = vld [vmem:[%s984_s3] sm:$0xff]  ;;  %s752_s7 = smov 127   ;;  %v300_v6 = vld [vmem:[%s984_s3 + $0x8] sm:$0xff]  ;;  %s753_s14 = smov 1   ;;  %vm320_vm1 = vcmask 1043456  }
  0x36   : > { %s278_s15 = scalar_select %p277_p11, %s811_s25, 1  ;;  %568 = vmatprep.mubr.msk.bf16.mxu0 %vm750_vm0, %v749_v0  ;;  %578 = vmatprep.mubr.msk.bf16.mxu1 %vm750_vm0, %v749_v0  ;;  %v645_v12 = vld [vmem:[%s983_s2] sm:$0xff]   ;;  %vm316_vm2 = vcmask 195584   ;;  %vm401_vm3 = vcmask 392192  }
  0x37   : > { %633 = vset.pattern.permute.xlu1 %v751_v4  ;;  %644 = vset.pattern.permute.xlu0 %v751_v4  ;;  %v395_v37 = vld [vmem:[%s986_s5] sm:$0xff]  ;;  %s545_s19 = sshll.u32 %s888_s20, 3  ;;  %p998_p13 = scmp.ne.s32.totalorder %s992_s9, 0 }
  0x38   : > { %s546_s17 = sshll.u32 %s278_s15, 3  ;;  %303 = vperm.xlu1 %633, %v299_v5   ;;  %v381_v46 = vld [vmem:[%s985_s4] sm:$0xf]  ;;  %s276_s8 = scalar_lea.vmem [#allocation5], %s545_s19 }
  0x39   : > { %s280_s29 = scalar_lea.vmem %s981_s0, %s546_s17  ;;  %s461_s12 = sshll.u32 %s276_s8, 4  ;;  %s940_s12 = int_to_ptr.vmem [resolvable:$true] %s461_s12 }
  0x3a   : > { %v283_v2 = vld [vmem:[%s280_s29] sm:$0xff]  ;;  %s554_s29 = sshll.u32 %s811_s25, 7  ;;  %s448_s25 = scalar_lea.sflag [#allocation4], %s888_s20 }
  0x3b   : > { %v292_v3 = vmul.f32 %v905_v1, %v283_v2  ;;  %s938_s13 = scalar_lea.hbm %s987_s6, %s554_s29  ;;  %s754_s16 = smov [#allocation5]  }
  0x3c   : > { %308 = vperm.xlu1 %633, %v300_v6   ;;  %s686_s26 = sshll.u32 %s754_s16, 4  ;;  %s687_s26 = int_to_ptr.vmem [resolvable:$false] %s686_s26 }
  0x3d   : > { %295 = vrot.lane.b32.xlu0 %v292_v3, %s752_s7  ;;  %s688_s28 = scalar_lea.vmem %s687_s26, 256  ;;  %p689_p5 = scmp.lt.s32.totalorder %s940_s12, %s687_s26 }
  0x41   : > { %293 = vrot.lane.b32.xlu0 %v292_v3, %s753_s14 }
  0xaf   : > { %v296_v7 = vpop.permute.xlu0 %295 }
  0xb0   : > { %v298_v8 = vpack.c.bf16 %v296_v7, %v296_v7 }
  0xb2   : > { %v322_v9 = vsel %vm320_vm1, %v298_v8, 0 }
  0xb3   : > { %565 = vmatpush3.bf16.msra.mxu0 %v322_v9  ;;  %v294_v10 = vpop.permute.xlu0 %293  ;;  %v304_v13 = vpop.permute.xlu1 %303 }
  0xb4   : > { %v297_v11 = vpack.c.bf16 %v292_v3, %v294_v10  ;;  %566 = vmatprep.subr.bf16.mxu0 %v749_v0 }
  0xb7   : > { %567 = vmatpush3.bf16.msra.mxu0 %v297_v11  ;;  %v309_v18 = vpop.permute.xlu1 %308 }
  0xba   : > { %569 = vmatmul.mubr.msk.bf16.vlgmr.msra.gmra.mxu0 %vm316_vm2, %v645_v12 }
 0x17a   : > { %v358_v14 = vpop.f32.mrf.mxu0 }
 0x17b   : > { %v359_v15 = vadd.f32 %v358_v14, %v304_v13 }
 0x17c   : > { %v570_v16 = vpop.f32.mrf.mxu0 }
 0x17d   : > { %v550_v17 = vmul.f32 -1.702, %v359_v15 }
 0x17e   : > { %v361_v19 = vpop.f32.mrf.mxu0 }
 0x17f   : > { %v369_v20 = vmul.f32 1.442695, %v550_v17  ;;  %v362_v21 = vadd.f32 %v361_v19, %v309_v18 }
 0x180   : > { %v571_v22 = vpop.f32.mrf.mxu0 }
 0x181   : > { %646 = vpow2.f32 %v369_v20  ;;  %v551_v23 = vmul.f32 -1.702, %v362_v21 }
 0x183   : > { %v371_v24 = vmul.f32 1.442695, %v551_v23 }
 0x185   : > { %648 = vpow2.f32 %v371_v24 }
 0x18e   : > { %v647_v25 = vpop.eup %646 }
 0x18f   : > { %v373_v26 = vadd.f32 1.0, %v647_v25 }
 0x191   : > { %650 = vrcp.f32 %v373_v26 }
 0x192   : > { %v649_v27 = vpop.eup %648 }
 0x193   : > { %v374_v28 = vadd.f32 1.0, %v649_v27 }
 0x195   : > { %652 = vrcp.f32 %v374_v28 }
 0x19e   : > { %v651_v29 = vpop.eup %650 }
 0x19f   : > { %v379_v30 = vmul.f32 %v651_v29, %v359_v15 }
 0x1a1   : > { %v382_v33 = vmul.f32 %v905_v1, %v379_v30 }
 0x1a2   : > { %v653_v31 = vpop.eup %652 }
 0x1a3   : > { %v380_v32 = vmul.f32 %v653_v31, %v362_v21 }
 0x1a5   : > { %v383_v34 = vmul.f32 %v905_v1, %v380_v32 }
 0x1a7   : > { %v639_v35 = vpack.i.bf16 %v383_v34, %v382_v33  ;;  %v393_v36 = vpack.c.bf16 %v383_v34, %v382_v33 }
 0x1a9   : > { %640 = vrot.lane.b32.xlu1 %v639_v35, %s753_s14  ;;  %635 = vrot.lane.b32.xlu0 %v639_v35, %s752_s7  ;;  %s682_s14 = scalar_lea.vmem %s940_s12, 128 }
 0x1aa   : > { %p683_p12 = scmp.ne.s32.totalorder %s940_s12, %s682_s14  ;;  %p690_p8 = scmp.lt.s32.totalorder %s688_s28, %s682_s14 }
 0x1ac   : > { %p684_p1 = pnand %p683_p12, %p998_p13  ;;  %p691_p10 = por %p690_p8, %p689_p5 }
 0x1ad   : > { %398 = vperm.xlu0 %644, %v395_v37  }
 0x1ae   : > { %p685_p3 = pneg %p684_p1 }
 0x1b0   : > { %p692_p2 = pnand %p691_p10, %p685_p3 }
 0x21b   : > { %v636_v38 = vpop.permute.xlu0 %635  ;;  %v641_v42 = vpop.permute.xlu1 %640 }
 0x21c   : > { %v638_v39 = vunpack.i.h.bf16 %v636_v38  ;;  %v637_v40 = vunpack.i.l.bf16 %v636_v38  ;;  %v643_v43 = vunpack.i.h.bf16 %v641_v42  ;;  %v642_v44 = vunpack.i.l.bf16 %v641_v42 }
 0x21e   : > { %v394_v41 = vpack.c.bf16 %v638_v39, %v637_v40  ;;  %v392_v45 = vpack.c.bf16 %v643_v43, %v642_v44 }
 0x220   : > { %573 = vmatpush3.bf16.msra.mxu1 %v394_v41 }
 0x221   : > { %574 = vmatprep.subr.bf16.mxu1 %v749_v0 }
 0x224   : > { %575 = vmatpush3.bf16.msra.mxu1 %v393_v36 }
 0x225   : > { %576 = vmatprep.subr.bf16.mxu1 %v749_v0 }
 0x228   : > { %577 = vmatpush3.bf16.msra.mxu1 %v392_v45  ;;  %v399_v47 = vpop.permute.xlu0 %398 }
 0x22b   : > { %579 = vmatmul.mubr.msk.bf16.vlgmr.msra.gmra.mxu1 %vm401_vm3, %v381_v46 }
 0x2eb   : > { %v439_v48 = vpop.f32.mrf.mxu1 }
 0x2ec   : > { %v440_v49 = vadd.f32 %v439_v48, %v399_v47 }
 0x2ed   : > { %v580_v50 = vpop.f32.mrf.mxu1 }
 0x2ee   : > { %v445_v51 = vmul.f32 %v905_v1, %v440_v49 }
 0x2ef   : > { %v442_v52 = vpop.f32.mrf.mxu1 }
 0x2f0   : > { %446 = vst [vmem:[%s276_s8] sm:$0xff] %v445_v51 }
 0x2f1   : > { %v581_v53 = vpop.f32.mrf.mxu1 }
 0x2f2   : > { %695 = shalt.err (!%p692_p2)
}
 0x2f3   : > { %s696_s15 = scalar_lea.hbm %s938_s13, 128  ;;  %s700_s18 = scalar_lea.hbm %s987_s6, 256 }
 0x2f4   : > { %p697_p4 = scmp.ne.s32.totalorder %s938_s13, %s696_s15  ;;  %p701_p0 = scmp.lt.s32.totalorder %s938_s13, %s987_s6 }
 0x2f5   : > { %p702_p6 = scmp.lt.s32.totalorder %s700_s18, %s696_s15 }
 0x2f6   : > { %p698_p9 = pnand %p697_p4, %p998_p13 }
 0x2f7   : > { %p703_p11 = por %p702_p6, %p701_p0 }
 0x2f8   : > { %p699_p7 = pneg %p698_p9 }
 0x2fa   : > { %p704_p12 = pnand %p703_p11, %p699_p7 }
 0x2fc   : > { %707 = shalt.err (!%p704_p12)
}
 0x2fd   : > { %584 = dma.vmem_to_hbm [thread:$0]  (%p998_p13), %s940_s12, 128, %s938_s13, %s448_s25  }
 0x2fe PF: > { %s473_s8 = sand.u32 1, %s734_s21   ;;  %p999_p1 = scmp.ne.s32.totalorder %s993_s10, 0 }
 0x2ff   : > { %p1000_p3 = scmp.ge.s32.totalorder %s746_s24, 2  ;;  %s474_s7 = scalar_lea.sflag [#allocation4], %s473_s8 }
 0x301   : > { %p591_p5 = pnand %p1000_p3, %p999_p1 }
 0x303   : > { %p592_p8 = pneg %p591_p5 }
 0x305   : > { %729 = dma.done.wait (%p592_p8), %s474_s7, 128  }
 0x306   : > { %731 = vsyncadd (%p592_p8), %s474_s7, 4294967168  ;;  %p19_p10 = scmp.ge.s32.totalorder %s815_s27, 4   ;;  %s1001_s21 = smov %s738_s22 }
 0x307   : > { %s1002_s22 = smov %s742_s23  ;;  %s1003_s23 = smov %s827_s30 }
 0x308   : > { %s1004_s24 = smov %s815_s27  ;;  %21 = sbr.rel (!%p19_p10) target bundleno = 5 (0x5), region = 92 }
 0x30d   :  { %479 = vsyncpa [#allocation3], 1 }
 0x30e   :  { %481 = vsyncpa [#allocation3 + $0x1], 1 }
 0x30f   :  { %482 = vsyncpa [#allocation4], 1 }
 0x310   :  { %484 = vsyncpa [#allocation4 + $0x1], 1 }

</bundles_post_ra>
